<compile_context>
chip_gen: v5e
topology: v5e:2x2
jax: 0.10.0
libtpu: 0.0.40
codegen_flags: <defaults>
</compile_context>

<pallas_src>
import functools

import jax
import jax.numpy as jnp
from jax.experimental import pallas as pl
from jax.experimental.pallas import tpu as pltpu

LANE = 128
SUBLANE = 8


def _round_up(n, m):
    return ((n + m - 1) // m) * m


def _pad_hidden(d):
    """Lane-friendly padded width for a hidden feature dim (48 -> 64, 32 -> 32)."""
    if d >= LANE:
        return _round_up(d, LANE)
    p = SUBLANE
    while p < d:
        p *= 2
    return p


def _mlp_kernel(x_ref, w_ref, b_ref, o_ref, *, layer_dims):
    """x_ref: (TB, in0) f32/bf16; w_ref: (L, MAX_IN, MAX_OUT) bf16;
    b_ref: (L, MAX_OUT) f32; o_ref: (TB, out_pad) bf16.
    layer_dims: tuple of (in_p, out_p) per layer (static)."""
    n_layers = len(layer_dims)
    h = x_ref[...]  # f32 (or bf16 if the producer already emits bf16)
    for li, (in_p, out_p) in enumerate(layer_dims):
        w = w_ref[li][:in_p, :out_p]            # bf16 (in_p, out_p), zero-padded
        b = b_ref[li:li + 1, :out_p]            # f32  (1, out_p)
        z = jnp.dot(h.astype(jnp.bfloat16), w,
                    preferred_element_type=jnp.float32) + b
        h = jnp.maximum(z, 0.0) if li < n_layers - 1 else z
    o_ref[...] = h.astype(o_ref.dtype)          # bf16 store, narrow (out_pad) lanes


def mlp_forward_padded(x, packed, *, tb_max=2048):
    """x: [B, input_size] (f32 or bf16).  Returns padded bf16 output
    [B_pad, out_pad]; padded rows/columns are garbage/zero and must be dropped
    by the consumer (net_forward does that)."""
    w_pack, b_pack, layer_dims = packed["w"], packed["b"], packed["layer_dims"]
    B, in_dim = x.shape
    out_pad = layer_dims[-1][1]

    # Batch tile: big (amortize ~0.35us/step pipeline overhead), multiple of 8,
    # but clamped so the grid has >=2 steps -> both v7x TensorCores stay fed.
    TB = min(tb_max, _round_up(max((B + 1) // 2, 1), SUBLANE))
    TB = max(TB, SUBLANE)
    B_pad = _round_up(B, TB)
    if B_pad != B:
        x = jnp.pad(x, ((0, B_pad - B), (0, 0)))

    kernel = functools.partial(_mlp_kernel, layer_dims=layer_dims)

    return pl.pallas_call(
        kernel,
        out_shape=jax.ShapeDtypeStruct((B_pad, out_pad), jnp.bfloat16),
        grid=(B_pad // TB,),
        in_specs=[
            pl.BlockSpec((TB, in_dim), lambda i: (i, 0)),
            pl.BlockSpec(w_pack.shape, lambda i: (0, 0, 0)),   # VMEM-resident params
            pl.BlockSpec(b_pack.shape, lambda i: (0, 0)),
        ],
        out_specs=pl.BlockSpec((TB, out_pad), lambda i: (i, 0)),
        compiler_params=pltpu.CompilerParams(
            dimension_semantics=("parallel",),      # shard batch tiles across TCs
            vmem_limit_bytes=32 * 1024 * 1024,      # headroom for big TB on v5e
        ),
    )(x, w_pack, b_pack)


def net_forward(x, packed, num_classes, *, tb_max=2048):
    out = mlp_forward_padded(x, packed, tb_max=tb_max)
    # Cheap now (bf16, 16 lanes). Consumers that accept the padded block should
    # use mlp_forward_padded directly and fuse/skip this slice.
    return out[: x.shape[0], :num_classes]


def init_params(key, dims):
    """f32 params matching nn.Linear init (uniform +-1/sqrt(fan_in)).
    dims = [input_size, hidden_size, hidden2_size, hidden3_size, num_classes].
    Weights stored as [in, out] (transposed vs. PyTorch)."""
    names = ["fc1", "fc2", "fc3", "fc4"]
    params = {}
    for li, name in enumerate(names):
        fan_in, fan_out = dims[li], dims[li + 1]
        key, kw, kb = jax.random.split(key, 3)
        bound = 1.0 / jnp.sqrt(jnp.float32(fan_in))
        w = jax.random.uniform(kw, (fan_in, fan_out), jnp.float32, -bound, bound)
        b = jax.random.uniform(kb, (1, fan_out), jnp.float32, -bound, bound)
        params[name] = (w, b)
    return params


def pack_params(params_f32, dims):
    """Zero-pad feature dims to lane-friendly widths and pack all layers into
    one bf16 weight tensor + one f32 bias tensor.  Zero padding is numerically
    exact through bias+ReLU (padded lanes stay 0) and padded output classes are
    sliced off by the wrapper."""
    names = ["fc1", "fc2", "fc3", "fc4"]
    n_layers = len(names)
    pad = ([dims[0]]
           + [_pad_hidden(d) for d in dims[1:-1]]
           + [_round_up(dims[-1], 16)])              # narrow output padding (16)
    layer_dims = tuple((pad[i], pad[i + 1]) for i in range(n_layers))
    max_in = max(d[0] for d in layer_dims)
    max_out = max(d[1] for d in layer_dims)

    w_pack = jnp.zeros((n_layers, max_in, max_out), jnp.float32)
    b_pack = jnp.zeros((n_layers, max_out), jnp.float32)
    for li, name in enumerate(names):
        w, b = params_f32[name]
        w_pack = w_pack.at[li, : w.shape[0], : w.shape[1]].set(w)
        b_pack = b_pack.at[li, : b.shape[1]].set(b[0])
    return {"w": w_pack.astype(jnp.bfloat16), "b": b_pack, "layer_dims": layer_dims}


def reference_forward(x, params_f32):
    h = x
    for name in ["fc1", "fc2", "fc3"]:
        w, b = params_f32[name]
        h = jnp.maximum(h @ w + b, 0.0)
    w, b = params_f32["fc4"]
    return h @ w + b


if __name__ == "__main__":
    # hidden2_size / hidden3_size are module-level constants in the original script.
    input_size, hidden_size, hidden2_size, hidden3_size, num_classes = 32, 64, 48, 32, 10
    dims = [input_size, hidden_size, hidden2_size, hidden3_size, num_classes]
    batch = 8

    key = jax.random.PRNGKey(0)
    key, kx = jax.random.split(key)
    x = jax.random.normal(kx, (batch, input_size), jnp.float32)

    params = init_params(key, dims)
    packed = pack_params(params, dims)

    # Small run (single tile).
    out = net_forward(x, packed, num_classes)
    jax.block_until_ready(out)
    ref = reference_forward(x, params)
    assert out.shape == (batch, num_classes)
    assert jnp.allclose(out.astype(jnp.float32), ref, atol=5e-2, rtol=5e-2), \
        "mismatch vs JAX reference (small)"

    # Multi-tile run: exercises grid=(2,), batch padding, and the parallel axis.
    key, kx2 = jax.random.split(key)
    x_big = jax.random.normal(kx2, (1000, input_size), jnp.float32)
    out_big = net_forward(x_big, packed, num_classes)   # TB=504, B_pad=1008, grid=(2,)
    jax.block_until_ready(out_big)
    ref_big = reference_forward(x_big, params)
    assert out_big.shape == (1000, num_classes)
    assert jnp.allclose(out_big.astype(jnp.float32), ref_big, atol=5e-2, rtol=5e-2), \
        "mismatch vs JAX reference (big)"

    print("KERNEL_OK")
</pallas_src>

<mosaic_0001>
module attributes {stable_mosaic.version = 11 : i64} {
  func.func @_mlp_kernel(%arg0: i32, %arg1: memref<8x32xf32, #tpu.memory_space<vmem>>, %arg2: memref<4x64x64xbf16, #tpu.memory_space<vmem>>, %arg3: memref<4x64xf32, #tpu.memory_space<vmem>>, %arg4: memref<8x16xbf16, #tpu.memory_space<vmem>>) attributes {dimension_semantics = [#tpu.dimension_semantics<parallel>], iteration_bounds = array<i64: 1>, scalar_prefetch = 0 : i64, scratch_operands = 0 : i64, tpu.core_type = #tpu.core_type<tc>, window_params = [{transform_indices = @transform_0, window_bounds = array<i64: 8, 32>}, {pipeline_mode = #tpu.pipeline_mode<synchronous>, transform_indices = @transform_1, window_bounds = array<i64: 4, 64, 64>}, {pipeline_mode = #tpu.pipeline_mode<synchronous>, transform_indices = @transform_2, window_bounds = array<i64: 4, 64>}, {transform_indices = @transform_3, window_bounds = array<i64: 8, 16>}]} {
    %c0 = arith.constant 0 : index
    %c0_0 = arith.constant 0 : index
    %0 = vector.load %arg1[%c0, %c0_0] : memref<8x32xf32, #tpu.memory_space<vmem>>, vector<8x32xf32>
    %c0_1 = arith.constant 0 : index
    %c0_2 = arith.constant 0 : index
    %c0_3 = arith.constant 0 : index
    %1 = vector.load %arg2[%c0_1, %c0_2, %c0_3] : memref<4x64x64xbf16, #tpu.memory_space<vmem>>, vector<1x64x64xbf16>
    %2 = vector.shape_cast %1 : vector<1x64x64xbf16> to vector<64x64xbf16>
    %3 = vector.extract_strided_slice %2 {offsets = [0, 0], sizes = [32, 64], strides = [1, 1]} : vector<64x64xbf16> to vector<32x64xbf16>
    %c0_4 = arith.constant 0 : index
    %c0_5 = arith.constant 0 : index
    %4 = vector.load %arg3[%c0_4, %c0_5] : memref<4x64xf32, #tpu.memory_space<vmem>>, vector<1x64xf32>
    %5 = arith.truncf %0 : vector<8x32xf32> to vector<8x32xbf16>
    %cst = arith.constant dense<0.000000e+00> : vector<8x64xf32>
    %6 = tpu.matmul %5, %3, %cst {dimension_numbers = #tpu.dot_dimension_numbers<[1], [0], [0], [1], [0, 0, 1, 1], [], []>} : vector<8x32xbf16>, vector<32x64xbf16>, vector<8x64xf32> -> vector<8x64xf32>
    %7 = vector.broadcast %4 : vector<1x64xf32> to vector<8x64xf32>
    %8 = arith.addf %6, %7 : vector<8x64xf32>
    %cst_6 = arith.constant 0.000000e+00 : f32
    %9 = vector.broadcast %cst_6 : f32 to vector<8x64xf32>
    %10 = arith.maximumf %8, %9 : vector<8x64xf32>
    %c1 = arith.constant 1 : index
    %c0_7 = arith.constant 0 : index
    %c0_8 = arith.constant 0 : index
    %11 = vector.load %arg2[%c1, %c0_7, %c0_8] : memref<4x64x64xbf16, #tpu.memory_space<vmem>>, vector<1x64x64xbf16>
    %12 = vector.shape_cast %11 : vector<1x64x64xbf16> to vector<64x64xbf16>
    %c1_9 = arith.constant 1 : index
    %c0_10 = arith.constant 0 : index
    %13 = vector.load %arg3[%c1_9, %c0_10] : memref<4x64xf32, #tpu.memory_space<vmem>>, vector<1x64xf32>
    %14 = arith.truncf %10 : vector<8x64xf32> to vector<8x64xbf16>
    %cst_11 = arith.constant dense<0.000000e+00> : vector<8x64xf32>
    %15 = tpu.matmul %14, %12, %cst_11 {dimension_numbers = #tpu.dot_dimension_numbers<[1], [0], [0], [1], [0, 0, 1, 1], [], []>} : vector<8x64xbf16>, vector<64x64xbf16>, vector<8x64xf32> -> vector<8x64xf32>
    %16 = vector.broadcast %13 : vector<1x64xf32> to vector<8x64xf32>
    %17 = arith.addf %15, %16 : vector<8x64xf32>
    %cst_12 = arith.constant 0.000000e+00 : f32
    %18 = vector.broadcast %cst_12 : f32 to vector<8x64xf32>
    %19 = arith.maximumf %17, %18 : vector<8x64xf32>
    %c2 = arith.constant 2 : index
    %c0_13 = arith.constant 0 : index
    %c0_14 = arith.constant 0 : index
    %20 = vector.load %arg2[%c2, %c0_13, %c0_14] : memref<4x64x64xbf16, #tpu.memory_space<vmem>>, vector<1x64x64xbf16>
    %21 = vector.shape_cast %20 : vector<1x64x64xbf16> to vector<64x64xbf16>
    %22 = vector.extract_strided_slice %21 {offsets = [0, 0], sizes = [64, 32], strides = [1, 1]} : vector<64x64xbf16> to vector<64x32xbf16>
    %c2_15 = arith.constant 2 : index
    %c0_16 = arith.constant 0 : index
    %23 = vector.load %arg3[%c2_15, %c0_16] : memref<4x64xf32, #tpu.memory_space<vmem>>, vector<1x32xf32>
    %24 = arith.truncf %19 : vector<8x64xf32> to vector<8x64xbf16>
    %cst_17 = arith.constant dense<0.000000e+00> : vector<8x32xf32>
    %25 = tpu.matmul %24, %22, %cst_17 {dimension_numbers = #tpu.dot_dimension_numbers<[1], [0], [0], [1], [0, 0, 1, 1], [], []>} : vector<8x64xbf16>, vector<64x32xbf16>, vector<8x32xf32> -> vector<8x32xf32>
    %26 = vector.broadcast %23 : vector<1x32xf32> to vector<8x32xf32>
    %27 = arith.addf %25, %26 : vector<8x32xf32>
    %cst_18 = arith.constant 0.000000e+00 : f32
    %28 = vector.broadcast %cst_18 : f32 to vector<8x32xf32>
    %29 = arith.maximumf %27, %28 : vector<8x32xf32>
    %c3 = arith.constant 3 : index
    %c0_19 = arith.constant 0 : index
    %c0_20 = arith.constant 0 : index
    %30 = vector.load %arg2[%c3, %c0_19, %c0_20] : memref<4x64x64xbf16, #tpu.memory_space<vmem>>, vector<1x64x64xbf16>
    %31 = vector.shape_cast %30 : vector<1x64x64xbf16> to vector<64x64xbf16>
    %32 = vector.extract_strided_slice %31 {offsets = [0, 0], sizes = [32, 16], strides = [1, 1]} : vector<64x64xbf16> to vector<32x16xbf16>
    %c3_21 = arith.constant 3 : index
    %c0_22 = arith.constant 0 : index
    %33 = vector.load %arg3[%c3_21, %c0_22] : memref<4x64xf32, #tpu.memory_space<vmem>>, vector<1x16xf32>
    %34 = arith.truncf %29 : vector<8x32xf32> to vector<8x32xbf16>
    %cst_23 = arith.constant dense<0.000000e+00> : vector<8x16xf32>
    %35 = tpu.matmul %34, %32, %cst_23 {dimension_numbers = #tpu.dot_dimension_numbers<[1], [0], [0], [1], [0, 0, 1, 1], [], []>} : vector<8x32xbf16>, vector<32x16xbf16>, vector<8x16xf32> -> vector<8x16xf32>
    %36 = vector.broadcast %33 : vector<1x16xf32> to vector<8x16xf32>
    %37 = arith.addf %35, %36 : vector<8x16xf32>
    %38 = arith.truncf %37 : vector<8x16xf32> to vector<8x16xbf16>
    %c0_24 = arith.constant 0 : index
    %c0_25 = arith.constant 0 : index
    %39 = vector.load %arg4[%c0_24, %c0_25] : memref<8x16xbf16, #tpu.memory_space<vmem>>, vector<8x16xbf16>
    tpu.vector_store %arg4[%c0_24, %c0_25], %38 {strides = array<i32>} : memref<8x16xbf16, #tpu.memory_space<vmem>>, vector<8x16xbf16>,
    return
  }
  func.func @transform_0(%arg0: i32) -> (i32, i32) {
    %c0_i32 = arith.constant 0 : i32
    %c0_i32_0 = arith.constant 0 : i32
    return %arg0, %c0_i32 : i32, i32
  }
  func.func @transform_1(%arg0: i32) -> (i32, i32, i32) {
    %c0_i32 = arith.constant 0 : i32
    %c0_i32_0 = arith.constant 0 : i32
    %c0_i32_1 = arith.constant 0 : i32
    %c0_i32_2 = arith.constant 0 : i32
    return %c0_i32, %c0_i32_0, %c0_i32_1 : i32, i32, i32
  }
  func.func @transform_2(%arg0: i32) -> (i32, i32) {
    %c0_i32 = arith.constant 0 : i32
    %c0_i32_0 = arith.constant 0 : i32
    %c0_i32_1 = arith.constant 0 : i32
    return %c0_i32, %c0_i32_0 : i32, i32
  }
  func.func @transform_3(%arg0: i32) -> (i32, i32) {
    %c0_i32 = arith.constant 0 : i32
    %c0_i32_0 = arith.constant 0 : i32
    return %arg0, %c0_i32 : i32, i32
  }
}

</mosaic_0001>

<bundles_post_ra>
// kernel: tpu_custom_call.1
= control target key start
LH: loop header
LB: loop body
LE: loop exit
PB: predicated region body
PF: predicated region fallthrough
CT: control target
= control target key end

     0   :  { %8 = vsyncpa [#allocation3], 0  ;;  %s477_s0 = inlined_call_operand.hbm [shape: f32[8,32], index: 0, kind: input, shape index: {}]   ;;  %s478_s1 = inlined_call_operand.hbm [shape: bf16[4,64,64], index: 1, kind: input, shape index: {}]   ;;  %s479_s2 = inlined_call_operand.hbm [shape: f32[4,64], index: 2, kind: input, shape index: {}]   ;;  %s480_s3 = inlined_call_operand.hbm [shape: bf16[8,16], index: 3, kind: output, shape index: {}]  }
   0x1   :  { %9 = vsyncpa [#allocation6], 0  ;;  %s26_s14 = sshll.u32 %s478_s1, 4  ;;  %s27_s14 = int_to_ptr.hbm [resolvable:$true] %s26_s14 }
   0x2   :  { %10 = vsyncpa [#allocation4], 0  ;;  %s437_s15 = smov [#allocation5]   ;;  %s16_s19 = sshll.u32 %s477_s0, 4  ;;  %s17_s19 = int_to_ptr.hbm [resolvable:$true] %s16_s19 }
   0x3   :  { %s28_s16 = sshll.u32 %s437_s15, 4  ;;  %s438_s20 = smov 64   ;;  %s29_s16 = int_to_ptr.vmem [resolvable:$true] %s28_s16 }
   0x4   :  { %s439_s21 = smov 4   ;;  %s440_s22 = smov [#allocation2]  }
   0x5   :  { %34 = dma.hbm_to_vmem [thread:$0]  %s27_s14, 2048, %s29_s16, [#allocation6], %s438_s20, %s438_s20, %s439_s21  }
   0x6   :  { %s18_s23 = sshll.u32 %s440_s22, 4  ;;  %s40_s26 = sshll.u32 %s479_s2, 4  ;;  %s19_s23 = int_to_ptr.vmem [resolvable:$true] %s18_s23  ;;  %s41_s26 = int_to_ptr.hbm [resolvable:$true] %s40_s26 }
   0x7   :  { %21 = dma.hbm_to_vmem [thread:$0]  %s17_s19, 128, %s19_s23, [#allocation3]  }
   0x8   :  { %s441_s1 = smov [#allocation7]  }
   0x9   :  { %s42_s27 = sshll.u32 %s441_s1, 4  ;;  %s43_s27 = int_to_ptr.vmem [resolvable:$true] %s42_s27 }
   0xa   :  { %45 = dma.hbm_to_vmem [thread:$0]  %s41_s26, 64, %s43_s27, [#allocation6]  }
   0xb   :  { %431 = dma.done.wait [#allocation3], 128  }
   0xc   :  { %432 = vsyncadd [#allocation3], 4294967168 }
   0xd   :  { %433 = dma.done.wait [#allocation6], 2112  }
   0xe   :  { %434 = vsyncadd [#allocation6], 4294965184  ;;  %v314_v0 = vld [vmem:[#allocation5 + $0x8] sm:$0xff]  ;;  %v313_v1 = vld [vmem:[#allocation5] sm:$0xff]  ;;  %vm79_vm0 = vcmask 261120   ;;  %vm133_vm1 = vcmask 523264  }
   0xf   :  { %v318_v2 = vld [vmem:[#allocation5 + $0x38] sm:$0xff]  ;;  %89 = vmatpush.bf16.msra.mxu0 %v314_v0  ;;  %v317_v4 = vld [vmem:[#allocation5 + $0x30] sm:$0xff]  ;;  %v316_v6 = vld [vmem:[#allocation5 + $0x28] sm:$0xff]  ;;  %s442_s0 = smov [#allocation8]   ;;  %s250_s30 = sshll.u32 %s480_s3, 4  ;;  %vm241_vm2 = vcmask 125952   ;;  %s251_s30 = int_to_ptr.hbm [resolvable:$true] %s250_s30 }
  0x10   :  { %v59_v3 = vld [vmem:[#allocation2] sm:$0xff]  ;;  %141 = vmatpush.bf16.msra.mxu1 %v318_v2  ;;  %v315_v7 = vld [vmem:[#allocation5 + $0x20] sm:$0xff]  ;;  %v321_v9 = vld [vmem:[#allocation5 + $0x50] sm:$0xff]  ;;  %s248_s2 = sshll.u32 %s442_s0, 4  ;;  %s249_s2 = int_to_ptr.vmem [resolvable:$true] %s248_s2 }
  0x11   :  { %v65_v5 = vpack.c.bf16 %v59_v3, %v59_v3  ;;  %v322_v8 = vld [vmem:[#allocation5 + $0x58] sm:$0xff]  ;;  %v331_v10 = vld [vmem:[#allocation7] ss:$0 sm:$0xff]  ;;  %v320_v16 = vld [vmem:[#allocation5 + $0x48] sm:$0xff] }
  0x12   :  { %194 = vmatpush.bf16.msra.mxu2 %v322_v8  ;;  %v319_v17 = vld [vmem:[#allocation5 + $0x40] sm:$0xff]  ;;  %v324_v24 = vld [vmem:[#allocation5 + $0x68] sm:$0xff] }
  0x13   :  { %90 = vmatpush.bf16.msra.mxu0 %v313_v1  ;;  %v332_v18 = vld [vmem:[#allocation7 + $0x1] ss:$0 sm:$0xff]  ;;  %233 = vmatpush.bf16.msra.mxu3 %v324_v24  ;;  %v333_v26 = vld [vmem:[#allocation7 + $0x2] ss:$0 sm:$0xff]  ;;  %v334_v32 = vld [vmem:[#allocation7 + $0x3] ss:$0 sm:$0xff] }
  0x14   :  { %142 = vmatpush.bf16.msra.mxu1 %v317_v4  ;;  %v323_v25 = vld [vmem:[#allocation5 + $0x60] sm:$0xff] }
  0x16   :  { %269 = vmatmul.msk.bf16.vlgmr.msra.gmra.mxu0 %vm79_vm0, %v65_v5  ;;  %195 = vmatpush.bf16.msra.mxu2 %v321_v9 }
  0x17   :  { %234 = vmatpush.bf16.msra.mxu3 %v323_v25 }
  0x18   :  { %143 = vmatpush.bf16.msra.mxu1 %v316_v6 }
  0x1a   :  { %196 = vmatpush.bf16.msra.mxu2 %v320_v16 }
  0x1c   :  { %144 = vmatpush.bf16.msra.mxu1 %v315_v7 }
  0x1e   :  { %197 = vmatpush.bf16.msra.mxu2 %v319_v17 }
  0x93   :  { %v92_v11 = vpop.f32.mrf.mxu0 }
  0x94   :  { %v93_v12 = vadd.f32 %v331_v10, %v92_v11 }
  0x96   :  { %v96_v13 = vmax.f32 %v93_v12, 0.0 }
  0x98   :  { %v107_v14 = vpack.c.bf16 %v96_v13, %v96_v13 }
  0x9a   :  { %286 = vmatmul.msk.bf16.vlgmr.msra.gmra.mxu1 %vm133_vm1, %v107_v14 }
  0x9b   :  { %v94_v15 = vpop.f32.mrf.mxu0 }
 0x117   :  { %v146_v19 = vpop.f32.mrf.mxu1 }
 0x118   :  { %v147_v20 = vadd.f32 %v332_v18, %v146_v19 }
 0x11a   :  { %v150_v21 = vmax.f32 %v147_v20, 0.0 }
 0x11c   :  { %v161_v22 = vpack.c.bf16 %v150_v21, %v150_v21 }
 0x11e   :  { %303 = vmatmul.msk.bf16.vlgmr.msra.gmra.mxu2 %vm133_vm1, %v161_v22 }
 0x11f   :  { %v148_v23 = vpop.f32.mrf.mxu1 }
 0x1a1   :  { %v199_v27 = vpop.f32.mrf.mxu2 }
 0x1a2   :  { %v200_v28 = vadd.f32 %v333_v26, %v199_v27 }
 0x1a4   :  { %v203_v29 = vmax.f32 %v200_v28, 0.0 }
 0x1a6   :  { %v210_v30 = vpack.c.bf16 %v203_v29, %v203_v29 }
 0x1a8   :  { %312 = vmatmul.msk.bf16.vlgmr.msra.gmra.mxu3 %vm79_vm0, %v210_v30 }
 0x1a9   :  { %v201_v31 = vpop.f32.mrf.mxu2 }
 0x22b   :  { %v236_v33 = vpop.f32.mrf.mxu3 }
 0x22c   :  { %v237_v34 = vadd.f32 %v334_v32, %v236_v33 }
 0x22e   :  { %v240_v35 = vpack.c.bf16 %v237_v34, %v237_v34 }
 0x230   :  { %242 = vst.msk [vmem:[#allocation8] sm:$0xf] %vm241_vm2, %v240_v35 }
 0x231   :  { %253 = dma.vmem_to_hbm [thread:$0]  %s249_s2, 64, %s251_s30, [#allocation4]  }
 0x233   :  { %v238_v36 = vpop.f32.mrf.mxu3 }
 0x234   :  { %435 = dma.done.wait [#allocation4], 64  }
 0x235   :  { %436 = vsyncadd [#allocation4], 4294967232 }
 0x236   :  { %258 = vsyncpa [#allocation3], 1 }
 0x237   :  { %259 = vsyncpa [#allocation6], 1 }
 0x238   :  { %260 = vsyncpa [#allocation4], 1 }

</bundles_post_ra>
